<compile_context>
chip_gen: v7x
topology: tpu7x:2x2x1
jax: 0.10.0
libtpu: 0.0.40
codegen_flags: <defaults>
</compile_context>

<pallas_src>
import functools

import jax
import jax.numpy as jnp
from jax import lax
from jax.experimental import pallas as pl
from jax.experimental.pallas import tpu as pltpu


def _round_up(x, m):
    return (x + m - 1) // m * m


def attention_scan_kernel(q_ref, enc_ref, ctx_ref, m_sc, l_sc, acc_sc,
                          *, seq_len, tile_s):
    """Online-softmax attention scan over encoder tiles.

    q_ref:   (1, Hp)   projected decoder query (q = hidden_dec @ W^T), resident
    enc_ref: (tS, Hp)  one streamed tile of encoder outputs
    ctx_ref: (1, Hp)   context vector (written on the last grid step)
    m_sc:    (1, 1)    running max of scores
    l_sc:    (1, 1)    running sum of exp(scores - m)
    acc_sc:  (1, Hp)   running exp-weighted sum of encoder rows
    """
    i = pl.program_id(0)

    @pl.when(i == 0)
    def _init():
        m_sc[...] = jnp.full(m_sc.shape, -jnp.inf, dtype=m_sc.dtype)
        l_sc[...] = jnp.zeros(l_sc.shape, dtype=l_sc.dtype)
        acc_sc[...] = jnp.zeros(acc_sc.shape, dtype=acc_sc.dtype)

    q = q_ref[...]        # (1, Hp)  f32
    enc = enc_ref[...]    # (tS, Hp) f32

    # scores = q @ enc^T : contract the hidden (lane) axis of BOTH operands —
    # no explicit transpose / VMEM relayout of the enc tile.
    s = lax.dot_general(q, enc, (((1,), (1,)), ((), ())),
                        preferred_element_type=jnp.float32)          # (1, tS)

    # Mask rows that belong to the S padding (static seq_len baked in).
    row = lax.broadcasted_iota(jnp.int32, s.shape, 1) + i * tile_s
    s = jnp.where(row < seq_len, s, -jnp.inf)

    # Online softmax update (flash-style running max / sum).
    m_prev = m_sc[...]
    m_new = jnp.maximum(m_prev, jnp.max(s, axis=-1, keepdims=True))  # (1, 1)
    alpha = jnp.exp(m_prev - m_new)                                  # (1, 1)
    p = jnp.exp(s - m_new)                                           # (1, tS)
    l_sc[...] = alpha * l_sc[...] + jnp.sum(p, axis=-1, keepdims=True)
    acc_sc[...] = alpha * acc_sc[...] + lax.dot_general(
        p, enc, (((1,), (0,)), ((), ())),
        preferred_element_type=jnp.float32)                          # (1, Hp)
    m_sc[...] = m_new

    @pl.when(i == pl.num_programs(0) - 1)
    def _finalize():
        inv_l = pl.reciprocal(l_sc[...], approx=True)   # EUP vrcp, ~free
        ctx_ref[...] = (acc_sc[...] * inv_l).astype(ctx_ref.dtype)


def attention_general(output_enc, hidden_dec, weight, *, max_tile_s=512):
    """output_enc: (1, S, H), hidden_dec: (1, 1, H), weight: (H, H) -> ctx (1, 1, H)."""
    assert output_enc.ndim == 3 and output_enc.shape[0] == 1
    assert hidden_dec.shape[:2] == (1, 1)
    _, S, H = output_enc.shape
    assert S >= 1 and hidden_dec.shape[2] == H and weight.shape == (H, H)

    # q projection hoisted out of the kernel: independent of S, keeps the (H, H)
    # weight out of VMEM entirely (it could never fit at large H on v7x).
    q = jnp.dot(hidden_dec.reshape(1, H).astype(jnp.float32),
                weight.astype(jnp.float32).T,
                preferred_element_type=jnp.float32)                  # (1, H)

    # Pad hidden to a full 128-lane multiple and S to the tile size.
    Hp = _round_up(H, 128)
    tS = min(max_tile_s, _round_up(S, 8))
    Sp = _round_up(S, tS)

    enc = output_enc.reshape(S, H).astype(jnp.float32)
    enc = jnp.pad(enc, ((0, Sp - S), (0, Hp - H)))                   # (Sp, Hp)
    q = jnp.pad(q, ((0, 0), (0, Hp - H)))                            # (1, Hp)

    kernel = functools.partial(attention_scan_kernel, seq_len=S, tile_s=tS)

    ctx = pl.pallas_call(
        kernel,
        out_shape=jax.ShapeDtypeStruct((1, Hp), jnp.float32),
        grid_spec=pltpu.PrefetchScalarGridSpec(
            num_scalar_prefetch=0,
            grid=(Sp // tS,),
            in_specs=[
                pl.BlockSpec((1, Hp), lambda i: (0, 0)),    # q: resident, DMA'd once
                pl.BlockSpec((tS, Hp), lambda i: (i, 0)),   # enc: streamed, double-buffered
            ],
            out_specs=pl.BlockSpec((1, Hp), lambda i: (0, 0)),
            scratch_shapes=[
                pltpu.VMEM((1, 1), jnp.float32),    # m  (running max)
                pltpu.VMEM((1, 1), jnp.float32),    # l  (running sum of exp)
                pltpu.VMEM((1, Hp), jnp.float32),   # acc (running context)
            ],
        ),
        compiler_params=pltpu.CompilerParams(
            # S is a (softmax) reduction axis -> "arbitrary".
            dimension_semantics=("arbitrary",)),
    )(q, enc)

    return ctx[:, :H].reshape(1, 1, H).astype(output_enc.dtype)


def attention_general_ref(output_enc, hidden_dec, weight):
    """Pure-JAX reference mirroring the PyTorch forward exactly."""
    q = jnp.einsum("bth,oh->bto", hidden_dec, weight)                # Linear, no bias
    scores = jnp.einsum("bto,bso->bts", q, output_enc)               # bmm with enc^T
    attn = jax.nn.softmax(scores.reshape(1, -1), axis=1)             # flatten-softmax
    ctx = jnp.einsum("bs,bsh->bh", attn, output_enc)[None, ...]      # bmm
    return ctx


if __name__ == "__main__":
    # Small shapes consistent with the module: batch=1, seq=8, hidden=32.
    B, S, H = 1, 8, 32
    key = jax.random.PRNGKey(0)
    k_enc, k_dec, k_w = jax.random.split(key, 3)

    output_enc = jax.random.normal(k_enc, (B, S, H), dtype=jnp.float32)
    hidden_dec = jax.random.normal(k_dec, (B, 1, H), dtype=jnp.float32)
    # Deterministic nn.Linear(hidden_size, hidden_size, bias=False) weight.
    bound = 1.0 / (H ** 0.5)
    weight = jax.random.uniform(k_w, (H, H), dtype=jnp.float32,
                                minval=-bound, maxval=bound)

    ctx = attention_general(output_enc, hidden_dec, weight)
    jax.block_until_ready(ctx)

    ref = attention_general_ref(output_enc, hidden_dec, weight)
    assert ctx.shape == (1, 1, H)
    # Tolerance relaxed to cover pl.reciprocal(approx=True) (~1e-3 rel error).
    assert jnp.allclose(ctx, ref, atol=2e-3, rtol=2e-3), "mismatch vs reference"

    print("KERNEL_OK")
</pallas_src>

<mosaic_0001>
module attributes {stable_mosaic.version = 11 : i64} {
  func.func @attention_scan_kernel(%arg0: i32, %arg1: memref<1x128xf32, #tpu.memory_space<vmem>>, %arg2: memref<8x128xf32, #tpu.memory_space<vmem>>, %arg3: memref<1x128xf32, #tpu.memory_space<vmem>>, %arg4: memref<1x1xf32, #tpu.memory_space<vmem>>, %arg5: memref<1x1xf32, #tpu.memory_space<vmem>>, %arg6: memref<1x128xf32, #tpu.memory_space<vmem>>) attributes {dimension_semantics = [#tpu.dimension_semantics<arbitrary>], iteration_bounds = array<i64: 1>, scalar_prefetch = 0 : i64, scratch_operands = 3 : i64, tpu.core_type = #tpu.core_type<tc>, window_params = [{pipeline_mode = #tpu.pipeline_mode<synchronous>, transform_indices = @transform_0, window_bounds = array<i64: 1, 128>}, {transform_indices = @transform_1, window_bounds = array<i64: 8, 128>}, {pipeline_mode = #tpu.pipeline_mode<synchronous>, transform_indices = @transform_2, window_bounds = array<i64: 1, 128>}]} {
    %c0_i32 = arith.constant 0 : i32
    %0 = arith.cmpi eq, %arg0, %c0_i32 : i32
    %1 = arith.extui %0 : i1 to i32
    %c0_i32_0 = arith.constant 0 : i32
    %2 = arith.cmpi ne, %1, %c0_i32_0 : i32
    scf.if %2 {
      %cst_23 = arith.constant 0xFF800000 : f32
      %39 = vector.broadcast %cst_23 : f32 to vector<1x1xf32>
      %c0_24 = arith.constant 0 : index
      %c0_25 = arith.constant 0 : index
      %40 = vector.load %arg4[%c0_24, %c0_25] : memref<1x1xf32, #tpu.memory_space<vmem>>, vector<1x1xf32>
      tpu.vector_store %arg4[%c0_24, %c0_25], %39 {strides = array<i32>} : memref<1x1xf32, #tpu.memory_space<vmem>>, vector<1x1xf32>,
      %cst_26 = arith.constant 0.000000e+00 : f32
      %41 = vector.broadcast %cst_26 : f32 to vector<1x1xf32>
      %c0_27 = arith.constant 0 : index
      %c0_28 = arith.constant 0 : index
      %42 = vector.load %arg5[%c0_27, %c0_28] : memref<1x1xf32, #tpu.memory_space<vmem>>, vector<1x1xf32>
      tpu.vector_store %arg5[%c0_27, %c0_28], %41 {strides = array<i32>} : memref<1x1xf32, #tpu.memory_space<vmem>>, vector<1x1xf32>,
      %cst_29 = arith.constant 0.000000e+00 : f32
      %43 = vector.broadcast %cst_29 : f32 to vector<1x128xf32>
      %c0_30 = arith.constant 0 : index
      %c0_31 = arith.constant 0 : index
      %44 = vector.load %arg6[%c0_30, %c0_31] : memref<1x128xf32, #tpu.memory_space<vmem>>, vector<1x128xf32>
      tpu.vector_store %arg6[%c0_30, %c0_31], %43 {strides = array<i32>} : memref<1x128xf32, #tpu.memory_space<vmem>>, vector<1x128xf32>,
    } else {
    }
    %c0 = arith.constant 0 : index
    %c0_1 = arith.constant 0 : index
    %3 = vector.load %arg1[%c0, %c0_1] : memref<1x128xf32, #tpu.memory_space<vmem>>, vector<1x128xf32>
    %c0_2 = arith.constant 0 : index
    %c0_3 = arith.constant 0 : index
    %4 = vector.load %arg2[%c0_2, %c0_3] : memref<8x128xf32, #tpu.memory_space<vmem>>, vector<8x128xf32>
    %cst = arith.constant dense<0.000000e+00> : vector<1x8xf32>
    %5 = tpu.matmul %3, %4, %cst {dimension_numbers = #tpu.dot_dimension_numbers<[1], [1], [0], [0], [0, 0, 1, 0], [], []>} : vector<1x128xf32>, vector<8x128xf32>, vector<1x8xf32> -> vector<1x8xf32>
    %6 = tpu.iota {dimensions = array<i32: 1>} : vector<1x8xi32>
    %c8_i32 = arith.constant 8 : i32
    %7 = arith.muli %arg0, %c8_i32 : i32
    %8 = vector.broadcast %7 : i32 to vector<1x8xi32>
    %9 = arith.addi %6, %8 : vector<1x8xi32>
    %c8_i32_4 = arith.constant 8 : i32
    %10 = vector.broadcast %c8_i32_4 : i32 to vector<1x8xi32>
    %11 = arith.cmpi slt, %9, %10 : vector<1x8xi32>
    %cst_5 = arith.constant 0xFF800000 : f32
    %12 = vector.broadcast %cst_5 : f32 to vector<1x8xf32>
    %13 = arith.select %11, %5, %12 : vector<1x8xi1>, vector<1x8xf32>
    %c0_6 = arith.constant 0 : index
    %c0_7 = arith.constant 0 : index
    %14 = vector.load %arg4[%c0_6, %c0_7] : memref<1x1xf32, #tpu.memory_space<vmem>>, vector<1x1xf32>
    %cst_8 = arith.constant dense<0xFF800000> : vector<1xf32>
    %15 = vector.multi_reduction <maximumf>, %13, %cst_8 [1] : vector<1x8xf32> to vector<1xf32>
    %16 = vector.shape_cast %15 : vector<1xf32> to vector<1x1xf32>
    %17 = arith.maximumf %14, %16 : vector<1x1xf32>
    %18 = arith.subf %14, %17 : vector<1x1xf32>
    %19 = math.exp %18 : vector<1x1xf32>
    %20 = vector.broadcast %17 : vector<1x1xf32> to vector<1x8xf32>
    %21 = arith.subf %13, %20 : vector<1x8xf32>
    %22 = math.exp %21 : vector<1x8xf32>
    %c0_9 = arith.constant 0 : index
    %c0_10 = arith.constant 0 : index
    %23 = vector.load %arg5[%c0_9, %c0_10] : memref<1x1xf32, #tpu.memory_space<vmem>>, vector<1x1xf32>
    %24 = arith.mulf %19, %23 : vector<1x1xf32>
    %cst_11 = arith.constant dense<0.000000e+00> : vector<1xf32>
    %25 = vector.multi_reduction <add>, %22, %cst_11 [1] : vector<1x8xf32> to vector<1xf32>
    %26 = vector.shape_cast %25 : vector<1xf32> to vector<1x1xf32>
    %27 = arith.addf %24, %26 : vector<1x1xf32>
    %c0_12 = arith.constant 0 : index
    %c0_13 = arith.constant 0 : index
    %28 = vector.load %arg5[%c0_12, %c0_13] : memref<1x1xf32, #tpu.memory_space<vmem>>, vector<1x1xf32>
    tpu.vector_store %arg5[%c0_12, %c0_13], %27 {strides = array<i32>} : memref<1x1xf32, #tpu.memory_space<vmem>>, vector<1x1xf32>,
    %c0_14 = arith.constant 0 : index
    %c0_15 = arith.constant 0 : index
    %29 = vector.load %arg6[%c0_14, %c0_15] : memref<1x128xf32, #tpu.memory_space<vmem>>, vector<1x128xf32>
    %30 = vector.broadcast %19 : vector<1x1xf32> to vector<1x128xf32>
    %31 = arith.mulf %30, %29 : vector<1x128xf32>
    %cst_16 = arith.constant dense<0.000000e+00> : vector<1x128xf32>
    %32 = tpu.matmul %22, %4, %cst_16 {dimension_numbers = #tpu.dot_dimension_numbers<[1], [0], [0], [1], [0, 0, 1, 1], [], []>} : vector<1x8xf32>, vector<8x128xf32>, vector<1x128xf32> -> vector<1x128xf32>
    %33 = arith.addf %31, %32 : vector<1x128xf32>
    %c0_17 = arith.constant 0 : index
    %c0_18 = arith.constant 0 : index
    %34 = vector.load %arg6[%c0_17, %c0_18] : memref<1x128xf32, #tpu.memory_space<vmem>>, vector<1x128xf32>
    tpu.vector_store %arg6[%c0_17, %c0_18], %33 {strides = array<i32>} : memref<1x128xf32, #tpu.memory_space<vmem>>, vector<1x128xf32>,
    %c0_19 = arith.constant 0 : index
    %c0_20 = arith.constant 0 : index
    %35 = vector.load %arg4[%c0_19, %c0_20] : memref<1x1xf32, #tpu.memory_space<vmem>>, vector<1x1xf32>
    tpu.vector_store %arg4[%c0_19, %c0_20], %17 {strides = array<i32>} : memref<1x1xf32, #tpu.memory_space<vmem>>, vector<1x1xf32>,
    %c0_i32_21 = arith.constant 0 : i32
    %36 = arith.cmpi eq, %arg0, %c0_i32_21 : i32
    %37 = arith.extui %36 : i1 to i32
    %c0_i32_22 = arith.constant 0 : i32
    %38 = arith.cmpi ne, %37, %c0_i32_22 : i32
    scf.if %38 {
      %c0_23 = arith.constant 0 : index
      %c0_24 = arith.constant 0 : index
      %39 = vector.load %arg5[%c0_23, %c0_24] : memref<1x1xf32, #tpu.memory_space<vmem>>, vector<1x1xf32>
      %40 = tpu.reciprocal %39 {approx = true} : vector<1x1xf32> -> vector<1x1xf32>
      %c0_25 = arith.constant 0 : index
      %c0_26 = arith.constant 0 : index
      %41 = vector.load %arg6[%c0_25, %c0_26] : memref<1x128xf32, #tpu.memory_space<vmem>>, vector<1x128xf32>
      %42 = vector.broadcast %40 : vector<1x1xf32> to vector<1x128xf32>
      %43 = arith.mulf %41, %42 : vector<1x128xf32>
      %c0_27 = arith.constant 0 : index
      %c0_28 = arith.constant 0 : index
      %44 = vector.load %arg3[%c0_27, %c0_28] : memref<1x128xf32, #tpu.memory_space<vmem>>, vector<1x128xf32>
      tpu.vector_store %arg3[%c0_27, %c0_28], %43 {strides = array<i32>} : memref<1x128xf32, #tpu.memory_space<vmem>>, vector<1x128xf32>,
    } else {
    }
    return
  }
  func.func @transform_0(%arg0: i32) -> (i32, i32) {
    %c0_i32 = arith.constant 0 : i32
    %c0_i32_0 = arith.constant 0 : i32
    %c0_i32_1 = arith.constant 0 : i32
    return %c0_i32, %c0_i32_0 : i32, i32
  }
  func.func @transform_1(%arg0: i32) -> (i32, i32) {
    %c0_i32 = arith.constant 0 : i32
    %c0_i32_0 = arith.constant 0 : i32
    return %arg0, %c0_i32 : i32, i32
  }
  func.func @transform_2(%arg0: i32) -> (i32, i32) {
    %c0_i32 = arith.constant 0 : i32
    %c0_i32_0 = arith.constant 0 : i32
    %c0_i32_1 = arith.constant 0 : i32
    return %c0_i32, %c0_i32_0 : i32, i32
  }
}

</mosaic_0001>

<bundles_post_ra>
// kernel: tpu_custom_call.1
= control target key start
LH: loop header
LB: loop body
LE: loop exit
PB: predicated region body
PF: predicated region fallthrough
CT: control target
= control target key end

     0   :  { %7 = vsyncpa [#allocation6], 0  ;;  %s439_s0 = inlined_call_operand.hbm [shape: f32[1,128], index: 0, kind: input, shape index: {}]   ;;  %s440_s1 = inlined_call_operand.hbm [shape: f32[8,128], index: 1, kind: input, shape index: {}]   ;;  %s441_s2 = inlined_call_operand.hbm [shape: f32[1,128], index: 2, kind: output, shape index: {}]  }
   0x1   :  { %8 = vsyncpa [#allocation9], 0 }
   0x2   :  { %9 = vsyncpa [#allocation7], 0  ;;  %s375_s9 = smov [#allocation5]   ;;  %s376_s11 = smov [#allocation8]  }
   0x3   :  { %s16_s10 = sshll.u32 %s375_s9, 4  ;;  %s26_s12 = sshll.u32 %s376_s11, 4  ;;  %s17_s10 = int_to_ptr.vmem [resolvable:$true] %s16_s10  ;;  %s27_s12 = int_to_ptr.vmem [resolvable:$true] %s26_s12 }
   0x4   :  { %s303_s15 = scalar_lea.hbm %s439_s0, 16 }
   0x5   :  { %p304_p0 = scmp.ne.s32.totalorder %s439_s0, %s303_s15  ;;  %p307_p1 = scmp.lt.u32.totalorder %s303_s15, %s439_s0 }
   0x7   :  { %p309_p2 = pnand %p307_p1, %p304_p0 }
   0x9   :  { %312 = shalt.err (!%p309_p2)
}
   0xa   :  { %s313_s20 = scalar_lea.vmem %s17_s10, 16  ;;  %s317_s21 = scalar_lea.vmem %s17_s10, 32 }
   0xb   :  { %p314_p3 = scmp.ne.s32.totalorder %s17_s10, %s313_s20  ;;  %p318_p4 = scmp.lt.s32.totalorder %s17_s10, %s17_s10 }
   0xc   :  { %p319_p5 = scmp.lt.s32.totalorder %s317_s21, %s313_s20 }
   0xe   :  { %p320_p6 = por %p319_p5, %p318_p4 }
  0x10   :  { %p321_p7 = pnand %p320_p6, %p314_p3 }
  0x12   :  { %324 = shalt.err (!%p321_p7)
}
  0x13   :  { %19 = dma.hbm_to_vmem [thread:$0]  %s439_s0, 16, %s17_s10, [#allocation6]  }
  0x14   :  { %s325_s26 = scalar_lea.hbm %s440_s1, 128 }
  0x15   :  { %p326_p8 = scmp.ne.s32.totalorder %s440_s1, %s325_s26  ;;  %p329_p9 = scmp.lt.u32.totalorder %s325_s26, %s440_s1 }
  0x17   :  { %p331_p10 = pnand %p329_p9, %p326_p8 }
  0x19   :  { %334 = shalt.err (!%p331_p10)
}
  0x1a   :  { %s335_s3 = scalar_lea.vmem %s27_s12, 128  ;;  %p340_p12 = scmp.lt.s32.totalorder %s27_s12, %s27_s12 }
  0x1b   :  { %p336_p11 = scmp.ne.s32.totalorder %s27_s12, %s335_s3  ;;  %p341_p13 = scmp.lt.s32.totalorder %s335_s3, %s335_s3 }
  0x1d   :  { %p342_p0 = por %p341_p13, %p340_p12 }
  0x1f   :  { %p343_p1 = pnand %p342_p0, %p336_p11 }
  0x21   :  { %346 = shalt.err (!%p343_p1)
}
  0x22   :  { %29 = dma.hbm_to_vmem [thread:$0]  %s440_s1, 128, %s27_s12, [#allocation9]  }
  0x23   :  { %369 = dma.done.wait [#allocation6], 16  }
  0x24   :  { %370 = vsyncadd [#allocation6], 4294967280 }
  0x25   :  { %371 = dma.done.wait [#allocation9], 128  }
  0x26   :  { %372 = vsyncadd [#allocation9], 4294967168  ;;  %v377_v0 = vmov 0.0   ;;  %vm378_vm0 = vmmov 0   ;;  %v45_v1 = vld [vmem:[#allocation8] sm:$0xff]  ;;  %vm40_vm1 = vcmask 0   ;;  %v116_v4 = vlaneseq }
  0x27   :  { %278 = vmatprep.subr.mxu0 %v377_v0  ;;  %43 = vst [vmem:[#allocation4] sm:$0x1] %v377_v0  ;;  %280 = vmatprep.mubr.msk.f32.mxu0 %vm378_vm0, %v377_v0  ;;  %v44_v2 = vld [vmem:[#allocation5] sm:$0x1]  ;;  %v379_v3 = vmov -inf   ;;  %vm124_vm3 = vcmask 57344  }
  0x28   :  { %283 = vmatprep.subr.mxu1 %v377_v0  ;;  %285 = vmatprep.mubr.msk.f32.mxu1 %vm378_vm0, %v377_v0  ;;  %41 = vst.msk [vmem:[#allocation2] sm:$0x1] %vm40_vm1, %v379_v3  ;;  %42 = vst.msk [vmem:[#allocation3] sm:$0x1] %vm40_vm1, %v377_v0  ;;  %v117_v5 = vand.u32 127, %v116_v4  ;;  %v380_v10 = vmov 0  }
  0x29   :  { %279 = vmatpush3.xpose.msra.mxu0 %v45_v1  ;;  %284 = vmatpush3.msra.mxu1 %v45_v1  ;;  %v138_v15 = vshrl.u32 %v116_v4, 7  ;;  %vm163_vm4 = vcmask 64512   ;;  %s381_s1 = smov [#allocation10]  }
  0x2a   :  { %vm121_vm2 = vcmp.lt.s32.totalorder %v117_v5, 8  ;;  %295 = vset.pattern.permute.xlu0 %v380_v10  ;;  %296 = vset.pattern.permute.xlu1 %v380_v10  ;;  %s263_s5 = sshll.u32 %s381_s1, 4  ;;  %s264_s5 = int_to_ptr.vmem [resolvable:$true] %s263_s5 }
  0x2b   :  { %v139_v16 = vsub.s32 0, %v138_v15  ;;  %s347_s6 = scalar_lea.vmem %s264_s5, 16  ;;  %s351_s7 = scalar_lea.vmem %s264_s5, 32 }
  0x2c   :  { %281 = vmatmul.mubr.f32.vlgmr.msra.gmra.mrb[0].mxu0 %v44_v2  ;;  %p348_p2 = scmp.ne.s32.totalorder %s264_s5, %s347_s6  ;;  %p352_p3 = scmp.lt.s32.totalorder %s264_s5, %s264_s5 }
  0x2d   :  { %p353_p4 = scmp.lt.s32.totalorder %s351_s7, %s347_s6 }
  0x2e   :  { %v152_v33 = vld [vmem:[#allocation4] sm:$0x1] }
  0x2f   :  { %v123_v11 = vld [vmem:[#allocation2] sm:$0x1]  ;;  %v144_v25 = vld [vmem:[#allocation3] sm:$0x1]  ;;  %p354_p5 = por %p353_p4, %p352_p3 }
  0x31   :  { %p355_p6 = pnand %p354_p5, %p348_p2 }
  0xff   :  { %v112_v6 = vpop.f32.mrb[0].mxu0 }
 0x100   :  { %v122_v7 = vsel %vm121_vm2, %v112_v6, -inf  ;;  %v282_v8 = vpop.f32.mrb[1].mxu0 }
 0x101   :  { %v125_v9 = vsel %vm124_vm3, %v122_v7, -inf }
 0x102   :  { %126 = vmax.xlane.f32.xlu0 %v125_v9 }
 0x18f   :  { %v127_v12 = vpop.xlane.xlu0 %126 }
 0x190   :  { %v128_v13 = vmax.f32 %v123_v11, %v127_v12 }
 0x192   :  { %v129_v14 = vsub.f32 %v123_v11, %v128_v13  ;;  %239 = vst.msk [vmem:[#allocation2] sm:$0x1] %vm40_vm1, %v128_v13  ;;  %134 = vperm.xlu0 %295, %v128_v13  }
 0x194   :  { %v130_v23 = vmul.f32 1.442695, %v129_v14 }
 0x211   :  { %v135_v17 = vpop.permute.xlu0 %134 }
 0x212   :  { %v140_v18 = vrot.slane %v135_v17, %v139_v16 }
 0x214   :  { %v141_v19 = vsub.f32 %v122_v7, %v140_v18 }
 0x216   :  { %v142_v20 = vmul.f32 1.442695, %v141_v19 }
 0x218   :  { %297 = vpow2.f32 %v142_v20 }
 0x219   :  { %299 = vpow2.f32 %v130_v23 }
 0x222   :  { %v298_v21 = vpop.eup %297 }
 0x223   :  { %286 = vmatmul.mubr.msk.f32.vlgmr.msra.gmra.mrb[0].mxu1 %vm163_vm4, %v298_v21  ;;  %v146_v22 = vsel %vm124_vm3, %v298_v21, 0.0  ;;  %v300_v24 = vpop.eup %299 }
 0x224   :  { %147 = vadd.xlane.f32.xlu1 %v146_v22  ;;  %v145_v26 = vmul.f32 %v300_v24, %v144_v25 }
 0x235   :  { %155 = vperm.xlu1 %296, %v300_v24  }
 0x2b1   :  { %v148_v27 = vpop.xlane.xlu1 %147 }
 0x2b2   :  { %v149_v28 = vadd.f32 %v148_v27, %v145_v26 }
 0x2b4   :  { %151 = vst.msk [vmem:[#allocation3] sm:$0x1] %vm40_vm1, %v149_v28 }
 0x2b5   :  { %v156_v31 = vpop.permute.xlu1 %155 }
 0x2b6   :  { %v161_v32 = vrot.slane %v156_v31, %v139_v16 }
 0x2b8   :  { %v162_v34 = vmul.f32 %v161_v32, %v152_v33 }
 0x2bb   :  { %v243_v29 = vld [vmem:[#allocation3] sm:$0x1] }
 0x2bc   :  { %301 = vrcp.f32 %v243_v29 }
 0x2c6   :  { %v302_v30 = vpop.eup %301 }
 0x2c7   :  { %248 = vperm.xlu1 %296, %v302_v30  }
 0x2f6   :  { %v233_v35 = vpop.f32.mrb[0].mxu1 }
 0x2f7   :  { %v237_v36 = vadd.f32 %v233_v35, %v162_v34  ;;  %v287_v37 = vpop.f32.mrb[1].mxu1 }
 0x2f9   :  { %238 = vst [vmem:[#allocation4] sm:$0x1] %v237_v36 }
 0x300   :  { %v245_v40 = vld [vmem:[#allocation4] sm:$0x1] }
 0x346   :  { %v249_v38 = vpop.permute.xlu1 %248 }
 0x347   :  { %v254_v39 = vrot.slane %v249_v38, %v139_v16 }
 0x349   :  { %v255_v41 = vmul.f32 %v254_v39, %v245_v40 }
 0x34b   :  { %256 = vst [vmem:[#allocation10] sm:$0x1] %v255_v41 }
 0x34c   :  { %358 = shalt.err (!%p355_p6)
}
 0x34d   :  { %s359_s10 = scalar_lea.hbm %s441_s2, 16 }
 0x34e   :  { %p360_p7 = scmp.ne.s32.totalorder %s441_s2, %s359_s10  ;;  %p363_p8 = scmp.lt.u32.totalorder %s359_s10, %s441_s2 }
 0x350   :  { %p365_p9 = pnand %p363_p8, %p360_p7 }
 0x352   :  { %368 = shalt.err (!%p365_p9)
}
 0x353   :  { %266 = dma.vmem_to_hbm [thread:$0]  %s264_s5, 16, %s441_s2, [#allocation7]  }
 0x354   :  { %373 = dma.done.wait [#allocation7], 16  }
 0x355   :  { %374 = vsyncadd [#allocation7], 4294967280 }
 0x356   :  { %270 = vsyncpa [#allocation6], 1 }
 0x357   :  { %271 = vsyncpa [#allocation9], 1 }
 0x358   :  { %272 = vsyncpa [#allocation7], 1 }

</bundles_post_ra>
